<compile_context>
chip_gen: v6e
topology: v6e:2x2x1
jax: 0.10.0
libtpu: 0.0.40
codegen_flags: <defaults>
</compile_context>

<pallas_src>
import functools

import jax
import jax.numpy as jnp
from jax import lax
from jax.experimental import pallas as pl
from jax.experimental.pallas import tpu as pltpu


def _round_up(x: int, m: int) -> int:
    return ((x + m - 1) // m) * m


def _static_int_pow(x, n: int):
    """x ** n for a static Python int n >= 1, via repeated multiplies (VPU only)."""
    assert isinstance(n, int) and n >= 1
    acc, base = None, x
    while n > 0:
        if n & 1:
            acc = base if acc is None else acc * base
        n >>= 1
        if n:
            base = base * base
    return acc


# ---- bounded-range sin -------------------------------------------------------
# Valid for |x| <= a few hundred (we clamp d_scaled<=1 so |x| <= pi*R_pad).
# n = nearest integer multiple of pi; r = x - n*pi via 2-term Cody-Waite
# (n*PI_A exact for small n); sin(x) = (-1)^n * sin(r), r in [-pi/2, pi/2],
# degree-11 odd Taylor polynomial (truncation error ~5.7e-8 at pi/2).
_INV_PI = 0.3183098861837907
_PI_A = 3.140625                       # 12-bit head, exact product for small n
_PI_B = 9.676535897932e-4              # pi - _PI_A
_S3, _S5, _S7 = -1.0 / 6.0, 1.0 / 120.0, -1.0 / 5040.0
_S9, _S11 = 1.0 / 362880.0, -1.0 / 39916800.0


def _bounded_sin(x):
    n = jnp.floor(x * _INV_PI + 0.5)            # nearest multiple of pi (float)
    r = (x - n * _PI_A) - n * _PI_B             # r in [-pi/2, pi/2]
    parity = n - 2.0 * jnp.floor(n * 0.5)       # 0.0 or 1.0
    sign = 1.0 - 2.0 * parity
    r2 = r * r
    poly = _S3 + r2 * (_S5 + r2 * (_S7 + r2 * (_S9 + r2 * _S11)))
    return sign * (r + r * r2 * poly)


# ---- kernel ------------------------------------------------------------------
def _bessel_kernel(d_ref, freq_ref, o_ref, *, inv_cutoff, p, a, b, c,
                   n_valid, fast_sin):
    # d_ref:    (1, TILE_N)     f32 -- raw distances, edges on the lane axis
    # freq_ref: (R_pad, 1)      f32 -- frequencies on the sublane axis (0-padded)
    # o_ref:    (R_pad, TILE_N) out_dtype
    tile = d_ref.shape[1]
    col = pl.program_id(0) * tile + lax.broadcasted_iota(jnp.int32, (1, tile), 1)
    # Lanes past the valid edge count (ragged last block, garbage from the
    # partial DMA) are forced to d_scaled = 1.0 -> envelope mask zeroes them and
    # 1/d stays finite; their output columns are discarded by Pallas anyway.
    d_scaled = jnp.where(col < n_valid, d_ref[...] * inv_cutoff, 1.0)   # (1, TILE_N)

    # Envelope(exponent): p = exponent + 1 (static ints -> pure VPU multiplies)
    x_pow_p0 = _static_int_pow(d_scaled, p - 1)
    x_pow_p1 = x_pow_p0 * d_scaled
    x_pow_p2 = x_pow_p1 * d_scaled
    env = 1.0 / d_scaled + a * x_pow_p0 + b * x_pow_p1 + c * x_pow_p2
    env = env * (d_scaled < 1.0).astype(d_scaled.dtype)                # (1, TILE_N)

    freq = freq_ref[...]                                               # (R_pad, 1)
    if fast_sin:
        # env==0 beyond the cutoff, so clamping the sin argument changes nothing
        # and keeps the range reduction exact (small n).
        s = _bounded_sin(freq * jnp.minimum(d_scaled, 1.0))            # (R_pad, TILE_N)
    else:
        s = jnp.sin(freq * d_scaled)
    o_ref[...] = (env * s).astype(o_ref.dtype)


# ---- wrapper -----------------------------------------------------------------
def bessel_basis_layer(inputs, frequencies, *, cutoff, envelope_exponent=5,
                       tile_n=32768, out_dtype=jnp.float32,
                       transpose_output=True, fast_sin=True):
    """inputs: (N,) distances; frequencies: (R,) learnable freqs.

    Returns (N, R) (PyTorch layout) if transpose_output, else the lane-dense
    (R, N) slab so the consumer can fold the transpose into its next matmul.
    out_dtype=jnp.bfloat16 halves HBM writeback and is recommended when the
    result feeds an MXU matmul.
    """
    N = int(inputs.shape[0])
    R = int(frequencies.shape[0])

    inv_cutoff = 1.0 / cutoff
    p = envelope_exponent + 1
    a = -(p + 1) * (p + 2) / 2.0
    b = float(p * (p + 2))
    c = -p * (p + 1) / 2.0

    # Lane tile: multiple of 128; default 32768 keeps per-step overhead <<1%
    # while staying far below scoped VMEM on every generation.  Prefer >= 2 grid
    # steps so the 'parallel' axis can shard across both v7x TensorCores.
    n128 = _round_up(N, 128)
    tile = min(_round_up(tile_n, 128), n128)
    if pl.cdiv(n128, tile) < 2 and n128 >= 256:
        tile = _round_up(pl.cdiv(n128, 2), 128)
    grid_n = pl.cdiv(N, tile)

    # Pad radial dim to a full packed sublane group (8 rows f32, 16 rows bf16)
    # so the output blocks are stored full-width; extra rows use freq=0 and are
    # sliced off below.
    sublane_group = max(8, 32 // jnp.dtype(out_dtype).itemsize)
    r_pad = _round_up(R, sublane_group)

    d_row = inputs.astype(jnp.float32).reshape(1, N)       # no full-array pad copy
    f_col = frequencies.astype(jnp.float32).reshape(R, 1)  # sublane axis
    if r_pad != R:
        f_col = jnp.concatenate(
            [f_col, jnp.zeros((r_pad - R, 1), jnp.float32)], axis=0)

    kernel = functools.partial(_bessel_kernel, inv_cutoff=inv_cutoff, p=p,
                               a=a, b=b, c=c, n_valid=N, fast_sin=fast_sin)

    out_t = pl.pallas_call(
        kernel,
        out_shape=jax.ShapeDtypeStruct((r_pad, N), out_dtype),
        grid_spec=pltpu.PrefetchScalarGridSpec(
            num_scalar_prefetch=0,
            grid=(grid_n,),
            in_specs=[
                pl.BlockSpec((1, tile), lambda i: (0, i)),
                pl.BlockSpec((r_pad, 1), lambda i: (0, 0)),   # constant tiny block
            ],
            out_specs=pl.BlockSpec((r_pad, tile), lambda i: (0, i)),
        ),
        compiler_params=pltpu.CompilerParams(
            dimension_semantics=("parallel",)),
    )(d_row, f_col)

    rbf = out_t if r_pad == R else out_t[:R]       # drop zero-frequency pad rows
    if transpose_output:
        # One (R, N) -> (N, R) transpose over valid data only.  For best perf,
        # use transpose_output=False and fold this into the downstream dense
        # projection (W @ rbf gives the already-projected, correctly-oriented slab).
        rbf = rbf.T
    return rbf


# ---- pure-JAX reference ------------------------------------------------------
def _reference(inputs, frequencies, *, cutoff, envelope_exponent=5):
    inv_cutoff = 1.0 / cutoff
    p = envelope_exponent + 1
    a = -(p + 1) * (p + 2) / 2.0
    b = float(p * (p + 2))
    c = -p * (p + 1) / 2.0
    d = (inputs * inv_cutoff)[:, None]
    x0 = d ** (p - 1)
    x1 = x0 * d
    x2 = x1 * d
    env = (1.0 / d + a * x0 + b * x1 + c * x2) * (d < 1.0).astype(d.dtype)
    return env * jnp.sin(frequencies[None, :] * d)


if __name__ == "__main__":
    key = jax.random.PRNGKey(0)
    N = 256            # number of edges (distances) — small test shape
    num_radial = 8
    cutoff = 5.0

    # deterministic parameter init, identical to the PyTorch module
    frequencies = jnp.pi * jnp.arange(1, num_radial + 1, dtype=jnp.float32)

    # distances in (0, 1.2*cutoff) so some fall outside the cutoff too
    inputs = jax.random.uniform(key, (N,), dtype=jnp.float32,
                                minval=0.05, maxval=1.2 * cutoff)

    ref = _reference(inputs, frequencies, cutoff=cutoff, envelope_exponent=5)

    # default path: f32 output, bounded-range sin, (N, R) PyTorch layout
    out = jax.block_until_ready(
        bessel_basis_layer(inputs, frequencies, cutoff=cutoff))
    assert out.shape == (N, num_radial)
    assert jnp.allclose(out, ref, atol=2e-5, rtol=2e-5), "mismatch (fast_sin)"

    # ragged edge count: partial last block handled by in-kernel masking, no pad copy
    out2 = jax.block_until_ready(
        bessel_basis_layer(inputs[:200], frequencies, cutoff=cutoff))
    assert out2.shape == (200, num_radial)
    assert jnp.all(jnp.isfinite(out2))
    assert jnp.allclose(out2, ref[:200], atol=2e-5, rtol=2e-5), "mismatch (ragged)"

    # exact jnp.sin path still matches tightly
    out3 = jax.block_until_ready(
        bessel_basis_layer(inputs, frequencies, cutoff=cutoff, fast_sin=False))
    assert jnp.allclose(out3, ref, atol=1e-5, rtol=1e-5), "mismatch (jnp.sin)"

    # bf16 writeback path (radial dim padded to 16 sublanes inside the kernel)
    out4 = jax.block_until_ready(
        bessel_basis_layer(inputs, frequencies, cutoff=cutoff,
                           out_dtype=jnp.bfloat16))
    assert out4.shape == (N, num_radial) and out4.dtype == jnp.bfloat16
    assert jnp.allclose(out4.astype(jnp.float32), ref, atol=0.05, rtol=0.02)

    # lane-dense (R, N) output for consumers that fold the transpose downstream
    out5 = jax.block_until_ready(
        bessel_basis_layer(inputs, frequencies, cutoff=cutoff,
                           transpose_output=False))
    assert out5.shape == (num_radial, N)
    assert jnp.allclose(out5.T, ref, atol=2e-5, rtol=2e-5)

    print("KERNEL_OK")
</pallas_src>

<mosaic_0001>
module attributes {stable_mosaic.version = 11 : i64} {
  func.func @_bessel_kernel(%arg0: i32, %arg1: memref<1x128xf32, #tpu.memory_space<vmem>>, %arg2: memref<8x1xf32, #tpu.memory_space<vmem>>, %arg3: memref<8x128xf32, #tpu.memory_space<vmem>>) attributes {dimension_semantics = [#tpu.dimension_semantics<parallel>], iteration_bounds = array<i64: 2>, scalar_prefetch = 0 : i64, scratch_operands = 0 : i64, tpu.core_type = #tpu.core_type<tc>, window_params = [{transform_indices = @transform_0, window_bounds = array<i64: 1, 128>}, {pipeline_mode = #tpu.pipeline_mode<synchronous>, transform_indices = @transform_1, window_bounds = array<i64: 8, 1>}, {transform_indices = @transform_2, window_bounds = array<i64: 8, 128>}]} {
    %c128_i32 = arith.constant 128 : i32
    %0 = arith.muli %arg0, %c128_i32 : i32
    %1 = tpu.iota {dimensions = array<i32: 1>} : vector<1x128xi32>
    %2 = vector.broadcast %0 : i32 to vector<1x128xi32>
    %3 = arith.addi %2, %1 : vector<1x128xi32>
    %c256_i32 = arith.constant 256 : i32
    %4 = vector.broadcast %c256_i32 : i32 to vector<1x128xi32>
    %5 = arith.cmpi slt, %3, %4 : vector<1x128xi32>
    %c0 = arith.constant 0 : index
    %c0_0 = arith.constant 0 : index
    %6 = vector.load %arg1[%c0, %c0_0] : memref<1x128xf32, #tpu.memory_space<vmem>>, vector<1x128xf32>
    %cst = arith.constant 2.000000e-01 : f32
    %7 = vector.broadcast %cst : f32 to vector<1x128xf32>
    %8 = arith.mulf %6, %7 : vector<1x128xf32>
    %cst_1 = arith.constant 1.000000e+00 : f32
    %9 = vector.broadcast %cst_1 : f32 to vector<1x128xf32>
    %10 = arith.select %5, %8, %9 : vector<1x128xi1>, vector<1x128xf32>
    %11 = arith.mulf %10, %10 : vector<1x128xf32>
    %12 = arith.mulf %11, %11 : vector<1x128xf32>
    %13 = arith.mulf %10, %12 : vector<1x128xf32>
    %14 = arith.mulf %13, %10 : vector<1x128xf32>
    %15 = arith.mulf %14, %10 : vector<1x128xf32>
    %cst_2 = arith.constant 1.000000e+00 : f32
    %16 = vector.broadcast %cst_2 : f32 to vector<1x128xf32>
    %17 = arith.divf %16, %10 : vector<1x128xf32>
    %cst_3 = arith.constant -2.800000e+01 : f32
    %18 = vector.broadcast %cst_3 : f32 to vector<1x128xf32>
    %19 = arith.mulf %18, %13 : vector<1x128xf32>
    %20 = arith.addf %17, %19 : vector<1x128xf32>
    %cst_4 = arith.constant 4.800000e+01 : f32
    %21 = vector.broadcast %cst_4 : f32 to vector<1x128xf32>
    %22 = arith.mulf %21, %14 : vector<1x128xf32>
    %23 = arith.addf %20, %22 : vector<1x128xf32>
    %cst_5 = arith.constant -2.100000e+01 : f32
    %24 = vector.broadcast %cst_5 : f32 to vector<1x128xf32>
    %25 = arith.mulf %24, %15 : vector<1x128xf32>
    %26 = arith.addf %23, %25 : vector<1x128xf32>
    %cst_6 = arith.constant 1.000000e+00 : f32
    %27 = vector.broadcast %cst_6 : f32 to vector<1x128xf32>
    %28 = arith.cmpf olt, %10, %27 : vector<1x128xf32>
    %29 = arith.extui %28 : vector<1x128xi1> to vector<1x128xi32>
    %30 = arith.sitofp %29 : vector<1x128xi32> to vector<1x128xf32>
    %31 = arith.mulf %26, %30 : vector<1x128xf32>
    %c0_7 = arith.constant 0 : index
    %c0_8 = arith.constant 0 : index
    %32 = vector.load %arg2[%c0_7, %c0_8] : memref<8x1xf32, #tpu.memory_space<vmem>>, vector<8x1xf32>
    %cst_9 = arith.constant 1.000000e+00 : f32
    %33 = vector.broadcast %cst_9 : f32 to vector<1x128xf32>
    %34 = arith.minimumf %10, %33 : vector<1x128xf32>
    %35 = vector.broadcast %32 : vector<8x1xf32> to vector<8x128xf32>
    %36 = vector.broadcast %34 : vector<1x128xf32> to vector<8x128xf32>
    %37 = arith.mulf %35, %36 : vector<8x128xf32>
    %cst_10 = arith.constant 0.318309873 : f32
    %38 = vector.broadcast %cst_10 : f32 to vector<8x128xf32>
    %39 = arith.mulf %37, %38 : vector<8x128xf32>
    %cst_11 = arith.constant 5.000000e-01 : f32
    %40 = vector.broadcast %cst_11 : f32 to vector<8x128xf32>
    %41 = arith.addf %39, %40 : vector<8x128xf32>
    %42 = math.floor %41 : vector<8x128xf32>
    %cst_12 = arith.constant 3.140625 : f32
    %43 = vector.broadcast %cst_12 : f32 to vector<8x128xf32>
    %44 = arith.mulf %42, %43 : vector<8x128xf32>
    %45 = arith.subf %37, %44 : vector<8x128xf32>
    %cst_13 = arith.constant 9.67653584E-4 : f32
    %46 = vector.broadcast %cst_13 : f32 to vector<8x128xf32>
    %47 = arith.mulf %42, %46 : vector<8x128xf32>
    %48 = arith.subf %45, %47 : vector<8x128xf32>
    %cst_14 = arith.constant 5.000000e-01 : f32
    %49 = vector.broadcast %cst_14 : f32 to vector<8x128xf32>
    %50 = arith.mulf %42, %49 : vector<8x128xf32>
    %51 = math.floor %50 : vector<8x128xf32>
    %cst_15 = arith.constant 2.000000e+00 : f32
    %52 = vector.broadcast %cst_15 : f32 to vector<8x128xf32>
    %53 = arith.mulf %52, %51 : vector<8x128xf32>
    %54 = arith.subf %42, %53 : vector<8x128xf32>
    %cst_16 = arith.constant 2.000000e+00 : f32
    %55 = vector.broadcast %cst_16 : f32 to vector<8x128xf32>
    %56 = arith.mulf %55, %54 : vector<8x128xf32>
    %cst_17 = arith.constant 1.000000e+00 : f32
    %57 = vector.broadcast %cst_17 : f32 to vector<8x128xf32>
    %58 = arith.subf %57, %56 : vector<8x128xf32>
    %59 = arith.mulf %48, %48 : vector<8x128xf32>
    %cst_18 = arith.constant -2.50521079E-8 : f32
    %60 = vector.broadcast %cst_18 : f32 to vector<8x128xf32>
    %61 = arith.mulf %59, %60 : vector<8x128xf32>
    %cst_19 = arith.constant 2.75573188E-6 : f32
    %62 = vector.broadcast %cst_19 : f32 to vector<8x128xf32>
    %63 = arith.addf %62, %61 : vector<8x128xf32>
    %64 = arith.mulf %59, %63 : vector<8x128xf32>
    %cst_20 = arith.constant -1.98412701E-4 : f32
    %65 = vector.broadcast %cst_20 : f32 to vector<8x128xf32>
    %66 = arith.addf %65, %64 : vector<8x128xf32>
    %67 = arith.mulf %59, %66 : vector<8x128xf32>
    %cst_21 = arith.constant 0.00833333377 : f32
    %68 = vector.broadcast %cst_21 : f32 to vector<8x128xf32>
    %69 = arith.addf %68, %67 : vector<8x128xf32>
    %70 = arith.mulf %59, %69 : vector<8x128xf32>
    %cst_22 = arith.constant -0.166666672 : f32
    %71 = vector.broadcast %cst_22 : f32 to vector<8x128xf32>
    %72 = arith.addf %71, %70 : vector<8x128xf32>
    %73 = arith.mulf %48, %59 : vector<8x128xf32>
    %74 = arith.mulf %73, %72 : vector<8x128xf32>
    %75 = arith.addf %48, %74 : vector<8x128xf32>
    %76 = arith.mulf %58, %75 : vector<8x128xf32>
    %77 = vector.broadcast %31 : vector<1x128xf32> to vector<8x128xf32>
    %78 = arith.mulf %77, %76 : vector<8x128xf32>
    %c0_23 = arith.constant 0 : index
    %c0_24 = arith.constant 0 : index
    %79 = vector.load %arg3[%c0_23, %c0_24] : memref<8x128xf32, #tpu.memory_space<vmem>>, vector<8x128xf32>
    tpu.vector_store %arg3[%c0_23, %c0_24], %78 {strides = array<i32>} : memref<8x128xf32, #tpu.memory_space<vmem>>, vector<8x128xf32>,
    return
  }
  func.func @transform_0(%arg0: i32) -> (i32, i32) {
    %c0_i32 = arith.constant 0 : i32
    %c0_i32_0 = arith.constant 0 : i32
    return %c0_i32, %arg0 : i32, i32
  }
  func.func @transform_1(%arg0: i32) -> (i32, i32) {
    %c0_i32 = arith.constant 0 : i32
    %c0_i32_0 = arith.constant 0 : i32
    %c0_i32_1 = arith.constant 0 : i32
    return %c0_i32, %c0_i32_0 : i32, i32
  }
  func.func @transform_2(%arg0: i32) -> (i32, i32) {
    %c0_i32 = arith.constant 0 : i32
    %c0_i32_0 = arith.constant 0 : i32
    return %c0_i32, %arg0 : i32, i32
  }
}

</mosaic_0001>

<bundles_post_ra>
// kernel: tpu_custom_call.1
= control target key start
LH: loop header
LB: loop body
LE: loop exit
PB: predicated region body
PF: predicated region fallthrough
CT: control target
= control target key end

     0   :  { %7 = vsyncpa [#allocation3], 0  ;;  %s505_s0 = inlined_call_operand.vmem [shape: f32[1,256], index: 0, kind: input, shape index: {}]   ;;  %s506_s1 = inlined_call_operand.vmem [shape: f32[8,1], index: 1, kind: input, shape index: {}]   ;;  %s507_s2 = inlined_call_operand.hbm [shape: f32[8,256], index: 2, kind: output, shape index: {}]  }
   0x1   :  { %9 = vsyncpa [#allocation3 + $0x1], 0  ;;  %s411_s9 = smov 0   ;;  %s413_s10 = smov 0  }
   0x2   :  { %s415_s11 = smov 0   ;;  %s417_s12 = smov 0  }
   0x3 LB: > { %s432_s13 = sadd.s32 4294967295, %s391_s12   ;;  %s276_s14 = sadd.s32 4294967294, %s391_s12   ;;  %s391_s12 = sphi %s417_s12, %s513_s12   ;;  %s387_s11 = sphi %s415_s11, %s512_s11   ;;  %s383_s10 = sphi %s413_s10, %s511_s10   ;;  %s379_s9 = sphi %s411_s9, %s510_s9  }
   0x4   : > { %s436_s15 = sadd.s32 1, %s391_s12   ;;  %s69_s16 = sadd.s32 1, %s387_s11 }
   0x5   : > { %s66_s17 = ssub.s32 %s391_s12, %s436_s15  ;;  %p79_p0 = scmp.ne.s32.totalorder %s387_s11, %s383_s10 }
   0x6   : > { %p67_p1 = scmp.eq.s32.totalorder %s66_s17, 0  ;;  %p80_p2 = scmp.eq.s32.totalorder %s432_s13, 1 }
   0x7   : > { %p85_p3 = scmp.ne.s32.totalorder %s383_s10, %s379_s9  ;;  %p86_p4 = scmp.eq.s32.totalorder %s276_s14, 1 }
   0x8   : > { %s447_s18 = scalar_select %p67_p1, %s387_s11, %s69_s16  }
   0x9   : > { %p449_p5 = por %p80_p2, %p79_p0  ;;  %p453_p6 = por %p86_p4, %p85_p3 }
   0xa   : > { %p279_p7 = scmp.ge.s32.totalorder %s391_s12, 1  ;;  %p113_p8 = scmp.lt.s32.totalorder %s391_s12, 3 }
   0xc   : > { %p114_p9 = pnand %p279_p7, %p113_p8 }
   0xd   : > { %p133_p10 = scmp.lt.s32.totalorder (!%p114_p9), %s432_s13, 1  ;;  %s281_s24 = sshll.u32 (!%p114_p9), %s432_s13, 7 }
   0xe   : > { %117 = sbr.rel (%p114_p9) target bundleno = 198 (0xc6), region = 28  ;;  %s130_s28 = sand.u32 (!%p114_p9), 1, %s383_s10  }
   0xf   : > { %s280_s29 = sshll.u32 (!%p114_p9), %s130_s28, 3  ;;  %s218_s6 = scalar_lea.hbm (!%p114_p9), %s507_s2, %s281_s24 }
  0x10   : > { %s132_s30 = scalar_lea.vmem (!%p114_p9), [#allocation2], %s280_s29  ;;  %s207_s7 = scalar_lea.sflag (!%p114_p9), [#allocation3], %s130_s28 }
  0x11   : > { %s220_s3 = sshll.u32 (!%p114_p9), %s132_s30, 4  ;;  %s395_s14 = smov (!%p114_p9), [#allocation2]   ;;  %s221_s3 = int_to_ptr.vmem [resolvable:$true] %s220_s3 }
  0x12   : > { %s331_s8 = scalar_lea.vmem (!%p114_p9), %s221_s3, 128  ;;  %s335_s16 = sshll.u32 (!%p114_p9), %s395_s14, 4  ;;  %s336_s16 = int_to_ptr.vmem [resolvable:$false] %s335_s16 }
  0x13   : > { %v162_v0 = vld [vmem:[%s506_s1] sm:$0xff]  ;;  %v393_v1 = vmov 0   ;;  %v137_v2 = vlaneseq  ;;  %s134_s23 = scalar_select %p133_p10, %s432_s13, 1  ;;  %v139_v4 = vstv %s281_s24  ;;  %v394_v45 = vmov 0.0  }
  0x14   : > { %328 = vset.pattern.permute.xlu0 %v393_v1  ;;  %p332_p11 = scmp.ne.s32.totalorder %s221_s3, %s331_s8  ;;  %s337_s17 = scalar_lea.vmem %s336_s16, 256 }
  0x15   : > { %166 = vperm.xlu0 %328, %v162_v0   ;;  %v138_v3 = vand.u32 127, %v137_v2  ;;  %s135_s27 = scalar_lea.vmem %s505_s0, %s134_s23  ;;  %v170_v8 = vshrl.u32 %v137_v2, 7  ;;  %p338_p0 = scmp.lt.s32.totalorder %s221_s3, %s336_s16 }
  0x16   : > { %v142_v6 = vld [vmem:[%s135_s27] sm:$0x1]  ;;  %p333_p12 = pnand %p332_p11, %p449_p5  ;;  %p339_p1 = scmp.lt.s32.totalorder %s337_s17, %s331_s8 }
  0x17   : > { %v140_v5 = vadd.s32 %v139_v4, %v138_v3  ;;  %v143_v7 = vmul.f32 0.2, %v142_v6  ;;  %v171_v11 = vsub.s32 0, %v170_v8 }
  0x18   : > { %p334_p13 = pneg %p333_p12  ;;  %p340_p2 = por %p339_p1, %p338_p0 }
  0x19   : > { %vm141_vm0 = vcmp.lt.s32.totalorder %v140_v5, 256 }
  0x1a   : > { %v144_v9 = vsel %vm141_vm0, %v143_v7, 1.0  ;;  %p341_p3 = pnand %p340_p2, %p334_p13 }
  0x1b   : > { %v163_v10 = vmin.f32 %v144_v9, 1.0  ;;  %v145_v15 = vmul.f32 %v144_v9, %v144_v9  ;;  %329 = vrcp.f32 %v144_v9  ;;  %vm158_vm1 = vcmp.lt.f32.partialorder %v144_v9, 1.0 }
  0x1c   : > { %v282_v46 = vsel %vm158_vm1, 1.0, %v394_v45 }
  0x1d   : > { %v172_v12 = vrot.slane %v163_v10, %v171_v11  ;;  %v146_v18 = vmul.f32 %v145_v15, %v145_v15 }
  0x1f   : > { %v147_v21 = vmul.f32 %v146_v18, %v144_v9 }
  0x21   : > { %v148_v25 = vmul.f32 %v147_v21, %v144_v9  ;;  %v152_v26 = vmul.f32 -28.0, %v147_v21 }
  0x23   : > { %v149_v31 = vmul.f32 %v148_v25, %v144_v9  ;;  %v154_v33 = vmul.f32 48.0, %v148_v25 }
  0x25   : > { %v156_v38 = vmul.f32 -21.0, %v149_v31 }
  0x28   : > { %v330_v29 = vpop.eup %329 }
  0x29   : > { %v153_v32 = vadd.f32 %v330_v29, %v152_v26 }
  0x2b   : > { %v155_v37 = vadd.f32 %v154_v33, %v153_v32 }
  0x2d   : > { %v157_v42 = vadd.f32 %v156_v38, %v155_v37 }
  0x2f   : > { %v161_v48 = vmul.f32 %v282_v46, %v157_v42 }
  0x31   : > { %v203_v54 = vrot.slane %v161_v48, %v171_v11 }
  0x90   : > { %v167_v13 = vpop.permute.xlu0 %166 }
  0x91   : > { %v173_v14 = vmul.f32 %v172_v12, %v167_v13 }
  0x93   : > { %v174_v16 = vmul.f32 0.31830987, %v173_v14 }
  0x95   : > { %v175_v17 = vadd.f32 0.5, %v174_v16 }
  0x97   : > { %v176_v19 = vfloor.f32 %v175_v17 }
  0x99   : > { %v177_v20 = vmul.f32 3.140625, %v176_v19  ;;  %v179_v23 = vmul.f32 0.0009676536, %v176_v19  ;;  %v181_v27 = vmul.f32 0.5, %v176_v19 }
  0x9b   : > { %v178_v22 = vsub.f32 %v173_v14, %v177_v20  ;;  %v182_v34 = vfloor.f32 %v181_v27 }
  0x9d   : > { %v180_v24 = vsub.f32 %v178_v22, %v179_v23  ;;  %v183_v40 = vmul.f32 2.0, %v182_v34 }
  0x9f   : > { %v187_v28 = vmul.f32 %v180_v24, %v180_v24  ;;  %v184_v44 = vsub.f32 %v176_v19, %v183_v40 }
  0xa1   : > { %v188_v30 = vmul.f32 -2.5052108e-08, %v187_v28  ;;  %v196_v50 = vmul.f32 %v187_v28, %v180_v24  ;;  %v185_v51 = vmul.f32 2.0, %v184_v44 }
  0xa3   : > { %v189_v35 = vadd.f32 2.7557319e-06, %v188_v30  ;;  %v186_v55 = vsub.f32 1.0, %v185_v51 }
  0xa5   : > { %v190_v36 = vmul.f32 %v189_v35, %v187_v28 }
  0xa7   : > { %v191_v39 = vadd.f32 -0.0001984127, %v190_v36 }
  0xa9   : > { %v192_v41 = vmul.f32 %v191_v39, %v187_v28 }
  0xab   : > { %v193_v43 = vadd.f32 0.008333334, %v192_v41 }
  0xad   : > { %v194_v47 = vmul.f32 %v193_v43, %v187_v28 }
  0xaf   : > { %v195_v49 = vadd.f32 -0.16666667, %v194_v47 }
  0xb1   : > { %v197_v52 = vmul.f32 %v196_v50, %v195_v49 }
  0xb3   : > { %v198_v53 = vadd.f32 %v197_v52, %v180_v24 }
  0xb5   : > { %v199_v56 = vmul.f32 %v198_v53, %v186_v55 }
  0xb7   : > { %v204_v57 = vmul.f32 %v203_v54, %v199_v56 }
  0xb9   : > { %205 = vst [vmem:[%s132_s30] sm:$0xff] %v204_v57 }
  0xba   : > { %344 = shalt.err (!%p341_p3)
}
  0xbb   : > { %s345_s13 = scalar_lea.hbm %s218_s6, 128  ;;  %s349_s23 = scalar_lea.hbm %s507_s2, 256 }
  0xbc   : > { %p346_p4 = scmp.ne.s32.totalorder %s218_s6, %s345_s13  ;;  %p350_p9 = scmp.lt.s32.totalorder %s218_s6, %s507_s2 }
  0xbd   : > { %p351_p10 = scmp.lt.s32.totalorder %s349_s23, %s345_s13 }
  0xbe   : > { %p347_p7 = pnand %p346_p4, %p449_p5 }
  0xbf   : > { %p352_p11 = por %p351_p10, %p350_p9 }
  0xc0   : > { %p348_p8 = pneg %p347_p7 }
  0xc2   : > { %p353_p12 = pnand %p352_p11, %p348_p8 }
  0xc4   : > { %356 = shalt.err (!%p353_p12)
}
  0xc5   : > { %287 = dma.vmem_to_hbm [thread:$0]  (%p449_p5), %s221_s3, 128, %s218_s6, %s207_s7  }
  0xc6 PF: > { %p293_p13 = scmp.ge.s32.totalorder %s391_s12, 2  ;;  %s232_s26 = sand.u32 1, %s379_s9  }
  0xc7   : > { %s233_s27 = scalar_lea.sflag [#allocation3], %s232_s26 }
  0xc8   : > { %p290_p0 = pnand %p293_p13, %p453_p6 }
  0xca   : > { %p291_p1 = pneg %p290_p0 }
  0xcc   : > { %374 = dma.done.wait (%p291_p1), %s233_s27, 128  }
  0xcd   : > { %376 = vsyncadd (%p291_p1), %s233_s27, 4294967168  ;;  %p12_p2 = scmp.ge.s32.totalorder %s436_s15, 4   ;;  %s510_s9 = smov %s383_s10 }
  0xce   : > { %s511_s10 = smov %s387_s11  ;;  %s512_s11 = smov %s447_s18 }
  0xcf   : > { %s513_s12 = smov %s436_s15  ;;  %14 = sbr.rel (!%p12_p2) target bundleno = 3 (0x3), region = 63 }
  0xd4   :  { %238 = vsyncpa [#allocation3], 1 }
  0xd5   :  { %240 = vsyncpa [#allocation3 + $0x1], 1 }

</bundles_post_ra>
